<compile_context>
chip_gen: v7x
topology: tpu7x:2x2x1
jax: 0.10.0
libtpu: 0.0.40
codegen_flags: <defaults>
</compile_context>

<pallas_src>
import jax
import jax.numpy as jnp
from jax.experimental import pallas as pl
from jax.experimental.pallas import tpu as pltpu

IN_FEATURES = 28 * 28   # 784
HIDDEN = 128
OUT_FEATURES = 10
OUT_PAD = 128           # lane-dense padded output width


def _mlp_kernel(x_ref, w1_ref, b1_ref, w2_ref, b2_ref, o_ref):
    # x_ref: (TM, 784) bf16   w1_ref: (784, 128) bf16   b1_ref: (1, 128) f32
    # w2_ref: (128, 128) bf16 (zero-padded cols)        b2_ref: (1, 128) f32
    # o_ref: (TM, 128) f32 (lane-dense; caller slices to 10)
    x = x_ref[...]
    h = jnp.dot(x, w1_ref[...], preferred_element_type=jnp.float32)   # MXU, f32 acc
    h = jnp.maximum(h + b1_ref[...], 0.0)                             # f32 epilogue
    y = jnp.dot(h.astype(jnp.bfloat16), w2_ref[...],
                preferred_element_type=jnp.float32)
    o_ref[...] = (y + b2_ref[...]).astype(o_ref.dtype)


def simple_nn_forward(x_nchw, w1, b1, w2, b2, *, tm=256):
    """x_nchw: (B, 1, 28, 28) f32. Returns logits (B, 10) f32."""
    B = x_nchw.shape[0]
    x_flat = x_nchw.reshape(B, IN_FEATURES).astype(jnp.bfloat16)  # == view(-1, 784)

    # Batch tile: multiple of 8 (sublane); either the full (rounded) batch
    # for tiny B, or 256 rows — 2 x 256 x 784 bf16 buffers ≈ 0.8 MiB, safe
    # under the scoped-VMEM default on v5e/v6e/v7x.
    tm = min(tm, max(8, ((B + 7) // 8) * 8))
    b_pad = pl.cdiv(B, tm) * tm
    if b_pad != B:
        x_flat = jnp.pad(x_flat, ((0, b_pad - B), (0, 0)))

    # Pre-cast weights to bf16 (halves HBM traffic, native MXU path) and
    # zero-pad fc2 to 128 output lanes for a dense output store.
    w1b = w1.astype(jnp.bfloat16)
    b1r = b1.reshape(1, HIDDEN).astype(jnp.float32)
    w2p = jnp.zeros((HIDDEN, OUT_PAD), jnp.bfloat16)
    w2p = w2p.at[:, :OUT_FEATURES].set(w2.astype(jnp.bfloat16))
    b2p = jnp.zeros((1, OUT_PAD), jnp.float32)
    b2p = b2p.at[:, :OUT_FEATURES].set(b2.astype(jnp.float32))

    out = pl.pallas_call(
        _mlp_kernel,
        out_shape=jax.ShapeDtypeStruct((b_pad, OUT_PAD), jnp.float32),
        grid=(b_pad // tm,),
        in_specs=[
            pl.BlockSpec((tm, IN_FEATURES), lambda i: (i, 0)),        # x: streamed
            pl.BlockSpec((IN_FEATURES, HIDDEN), lambda i: (0, 0)),    # w1: resident
            pl.BlockSpec((1, HIDDEN), lambda i: (0, 0)),              # b1: resident
            pl.BlockSpec((HIDDEN, OUT_PAD), lambda i: (0, 0)),        # w2: resident
            pl.BlockSpec((1, OUT_PAD), lambda i: (0, 0)),             # b2: resident
        ],
        out_specs=pl.BlockSpec((tm, OUT_PAD), lambda i: (i, 0)),
        compiler_params=pltpu.CompilerParams(
            dimension_semantics=("parallel",)),                       # megacore on v7x
    )(x_flat, w1b, b1r, w2p, b2p)

    return out[:B, :OUT_FEATURES]


def init_params(key):
    """Deterministic init mimicking nn.Linear's Kaiming-uniform defaults."""
    k1, k2, k3, k4 = jax.random.split(key, 4)
    bound1 = 1.0 / jnp.sqrt(IN_FEATURES)
    bound2 = 1.0 / jnp.sqrt(HIDDEN)
    # stored as (in, out) so the kernel does x @ W + b
    w1 = jax.random.uniform(k1, (IN_FEATURES, HIDDEN), jnp.float32,
                            minval=-bound1, maxval=bound1)
    b1 = jax.random.uniform(k2, (HIDDEN,), jnp.float32,
                            minval=-bound1, maxval=bound1)
    w2 = jax.random.uniform(k3, (HIDDEN, OUT_FEATURES), jnp.float32,
                            minval=-bound2, maxval=bound2)
    b2 = jax.random.uniform(k4, (OUT_FEATURES,), jnp.float32,
                            minval=-bound2, maxval=bound2)
    return w1, b1, w2, b2


if __name__ == "__main__":
    key = jax.random.PRNGKey(0)
    kx, kp = jax.random.split(key)

    B = 8
    x = jax.random.normal(kx, (B, 1, 28, 28), dtype=jnp.float32)  # NCHW like PyTorch
    w1, b1, w2, b2 = init_params(kp)

    out = simple_nn_forward(x, w1, b1, w2, b2)
    out = jax.block_until_ready(out)

    # Sanity check against pure-JAX f32 reference (kernel uses bf16 operands
    # with f32 accumulation, so use a tolerance that absorbs bf16 rounding).
    x_flat = x.reshape(B, IN_FEATURES)
    ref = jnp.maximum(x_flat @ w1 + b1, 0.0) @ w2 + b2
    assert out.shape == (B, OUT_FEATURES)
    assert jnp.allclose(out, ref, atol=2e-2, rtol=2e-2), (
        float(jnp.max(jnp.abs(out - ref))))

    print("KERNEL_OK")
</pallas_src>

<mosaic_0001>
module attributes {stable_mosaic.version = 11 : i64} {
  func.func @_mlp_kernel(%arg0: i32, %arg1: memref<8x784xbf16, #tpu.memory_space<vmem>>, %arg2: memref<784x128xbf16, #tpu.memory_space<vmem>>, %arg3: memref<1x128xf32, #tpu.memory_space<vmem>>, %arg4: memref<128x128xbf16, #tpu.memory_space<vmem>>, %arg5: memref<1x128xf32, #tpu.memory_space<vmem>>, %arg6: memref<8x128xf32, #tpu.memory_space<vmem>>) attributes {dimension_semantics = [#tpu.dimension_semantics<parallel>], iteration_bounds = array<i64: 1>, scalar_prefetch = 0 : i64, scratch_operands = 0 : i64, tpu.core_type = #tpu.core_type<tc>, window_params = [{transform_indices = @transform_0, window_bounds = array<i64: 8, 784>}, {pipeline_mode = #tpu.pipeline_mode<synchronous>, transform_indices = @transform_1, window_bounds = array<i64: 784, 128>}, {pipeline_mode = #tpu.pipeline_mode<synchronous>, transform_indices = @transform_2, window_bounds = array<i64: 1, 128>}, {pipeline_mode = #tpu.pipeline_mode<synchronous>, transform_indices = @transform_3, window_bounds = array<i64: 128, 128>}, {pipeline_mode = #tpu.pipeline_mode<synchronous>, transform_indices = @transform_4, window_bounds = array<i64: 1, 128>}, {transform_indices = @transform_5, window_bounds = array<i64: 8, 128>}]} {
    %c0 = arith.constant 0 : index
    %c0_0 = arith.constant 0 : index
    %0 = vector.load %arg1[%c0, %c0_0] : memref<8x784xbf16, #tpu.memory_space<vmem>>, vector<8x784xbf16>
    %c0_1 = arith.constant 0 : index
    %c0_2 = arith.constant 0 : index
    %1 = vector.load %arg2[%c0_1, %c0_2] : memref<784x128xbf16, #tpu.memory_space<vmem>>, vector<784x128xbf16>
    %cst = arith.constant dense<0.000000e+00> : vector<8x128xf32>
    %2 = tpu.matmul %0, %1, %cst {dimension_numbers = #tpu.dot_dimension_numbers<[1], [0], [0], [1], [0, 0, 1, 1], [], []>} : vector<8x784xbf16>, vector<784x128xbf16>, vector<8x128xf32> -> vector<8x128xf32>
    %c0_3 = arith.constant 0 : index
    %c0_4 = arith.constant 0 : index
    %3 = vector.load %arg3[%c0_3, %c0_4] : memref<1x128xf32, #tpu.memory_space<vmem>>, vector<1x128xf32>
    %4 = vector.broadcast %3 : vector<1x128xf32> to vector<8x128xf32>
    %5 = arith.addf %2, %4 : vector<8x128xf32>
    %cst_5 = arith.constant 0.000000e+00 : f32
    %6 = vector.broadcast %cst_5 : f32 to vector<8x128xf32>
    %7 = arith.maximumf %5, %6 : vector<8x128xf32>
    %8 = arith.truncf %7 : vector<8x128xf32> to vector<8x128xbf16>
    %c0_6 = arith.constant 0 : index
    %c0_7 = arith.constant 0 : index
    %9 = vector.load %arg4[%c0_6, %c0_7] : memref<128x128xbf16, #tpu.memory_space<vmem>>, vector<128x128xbf16>
    %cst_8 = arith.constant dense<0.000000e+00> : vector<8x128xf32>
    %10 = tpu.matmul %8, %9, %cst_8 {dimension_numbers = #tpu.dot_dimension_numbers<[1], [0], [0], [1], [0, 0, 1, 1], [], []>} : vector<8x128xbf16>, vector<128x128xbf16>, vector<8x128xf32> -> vector<8x128xf32>
    %c0_9 = arith.constant 0 : index
    %c0_10 = arith.constant 0 : index
    %11 = vector.load %arg5[%c0_9, %c0_10] : memref<1x128xf32, #tpu.memory_space<vmem>>, vector<1x128xf32>
    %12 = vector.broadcast %11 : vector<1x128xf32> to vector<8x128xf32>
    %13 = arith.addf %10, %12 : vector<8x128xf32>
    %c0_11 = arith.constant 0 : index
    %c0_12 = arith.constant 0 : index
    %14 = vector.load %arg6[%c0_11, %c0_12] : memref<8x128xf32, #tpu.memory_space<vmem>>, vector<8x128xf32>
    tpu.vector_store %arg6[%c0_11, %c0_12], %13 {strides = array<i32>} : memref<8x128xf32, #tpu.memory_space<vmem>>, vector<8x128xf32>,
    return
  }
  func.func @transform_0(%arg0: i32) -> (i32, i32) {
    %c0_i32 = arith.constant 0 : i32
    %c0_i32_0 = arith.constant 0 : i32
    return %arg0, %c0_i32 : i32, i32
  }
  func.func @transform_1(%arg0: i32) -> (i32, i32) {
    %c0_i32 = arith.constant 0 : i32
    %c0_i32_0 = arith.constant 0 : i32
    %c0_i32_1 = arith.constant 0 : i32
    return %c0_i32, %c0_i32_0 : i32, i32
  }
  func.func @transform_2(%arg0: i32) -> (i32, i32) {
    %c0_i32 = arith.constant 0 : i32
    %c0_i32_0 = arith.constant 0 : i32
    %c0_i32_1 = arith.constant 0 : i32
    return %c0_i32, %c0_i32_0 : i32, i32
  }
  func.func @transform_3(%arg0: i32) -> (i32, i32) {
    %c0_i32 = arith.constant 0 : i32
    %c0_i32_0 = arith.constant 0 : i32
    %c0_i32_1 = arith.constant 0 : i32
    return %c0_i32, %c0_i32_0 : i32, i32
  }
  func.func @transform_4(%arg0: i32) -> (i32, i32) {
    %c0_i32 = arith.constant 0 : i32
    %c0_i32_0 = arith.constant 0 : i32
    %c0_i32_1 = arith.constant 0 : i32
    return %c0_i32, %c0_i32_0 : i32, i32
  }
  func.func @transform_5(%arg0: i32) -> (i32, i32) {
    %c0_i32 = arith.constant 0 : i32
    %c0_i32_0 = arith.constant 0 : i32
    return %arg0, %c0_i32 : i32, i32
  }
}

</mosaic_0001>

<bundles_post_ra>
// kernel: tpu_custom_call.1
= control target key start
LH: loop header
LB: loop body
LE: loop exit
PB: predicated region body
PF: predicated region fallthrough
CT: control target
= control target key end

     0   :  { %10 = vsyncpa [#allocation3], 0  ;;  %s1218_s0 = inlined_call_operand.hbm [shape: bf16[8,784], index: 0, kind: input, shape index: {}]   ;;  %s1219_s1 = inlined_call_operand.hbm [shape: bf16[784,128], index: 1, kind: input, shape index: {}]   ;;  %s1220_s2 = inlined_call_operand.vmem [shape: f32[1,128], index: 2, kind: input, shape index: {}]   ;;  %s1221_s3 = inlined_call_operand.hbm [shape: bf16[128,128], index: 3, kind: input, shape index: {}]   ;;  %s1222_s4 = inlined_call_operand.vmem [shape: f32[1,128], index: 4, kind: input, shape index: {}]   ;;  %s1223_s5 = inlined_call_operand.hbm [shape: f32[8,128], index: 5, kind: output, shape index: {}]  }
   0x1   :  { %11 = vsyncpa [#allocation6], 0 }
   0x2   :  { %12 = vsyncpa [#allocation4], 0  ;;  %s1118_s18 = smov [#allocation5]   ;;  %s1024_s22 = scalar_lea.hbm %s1219_s1, 6272 }
   0x3   :  { %s28_s19 = sshll.u32 %s1118_s18, 4  ;;  %p1025_p0 = scmp.ne.s32.totalorder %s1219_s1, %s1024_s22  ;;  %s29_s19 = int_to_ptr.vmem [resolvable:$true] %s28_s19 }
   0x4   :  { %p1028_p1 = scmp.lt.u32.totalorder %s1024_s22, %s1219_s1 }
   0x6   :  { %p1030_p2 = pnand %p1028_p1, %p1025_p0 }
   0x8   :  { %1033 = shalt.err (!%p1030_p2)
}
   0x9   :  { %s1034_s27 = scalar_lea.vmem %s29_s19, 6272  ;;  %p1039_p4 = scmp.lt.s32.totalorder %s29_s19, %s29_s19 }
   0xa   :  { %p1035_p3 = scmp.ne.s32.totalorder %s29_s19, %s1034_s27  ;;  %p1040_p5 = scmp.lt.s32.totalorder %s1034_s27, %s1034_s27 }
   0xc   :  { %p1041_p6 = por %p1040_p5, %p1039_p4 }
   0xe   :  { %p1042_p7 = pnand %p1041_p6, %p1035_p3 }
  0x10   :  { %1045 = shalt.err (!%p1042_p7)
}
  0x11   :  { %s1119_s28 = smov 64   ;;  %s1120_s29 = smov 4  }
  0x12   :  { %34 = dma.hbm_to_vmem [thread:$0]  %s1219_s1, 6272, %s29_s19, [#allocation6], %s1119_s28, %s1119_s28, %s1120_s29  }
  0x13   :  { %s1121_s7 = smov [#allocation2]   ;;  %s1122_s9 = smov [#allocation7]  }
  0x14   :  { %s19_s8 = sshll.u32 %s1121_s7, 4  ;;  %s42_s10 = sshll.u32 %s1122_s9, 4  ;;  %s20_s8 = int_to_ptr.vmem [resolvable:$true] %s19_s8  ;;  %s43_s10 = int_to_ptr.vmem [resolvable:$true] %s42_s10 }
  0x15   :  { %s1046_s13 = scalar_lea.hbm %s1218_s0, 448 }
  0x16   :  { %p1047_p8 = scmp.ne.s32.totalorder %s1218_s0, %s1046_s13  ;;  %p1050_p9 = scmp.lt.u32.totalorder %s1046_s13, %s1218_s0 }
  0x18   :  { %p1052_p10 = pnand %p1050_p9, %p1047_p8 }
  0x1a   :  { %1055 = shalt.err (!%p1052_p10)
}
  0x1b   :  { %s1056_s1 = scalar_lea.vmem %s20_s8, 448  ;;  %p1061_p12 = scmp.lt.s32.totalorder %s20_s8, %s20_s8 }
  0x1c   :  { %p1057_p11 = scmp.ne.s32.totalorder %s20_s8, %s1056_s1  ;;  %p1062_p13 = scmp.lt.s32.totalorder %s1056_s1, %s1056_s1 }
  0x1e   :  { %p1063_p0 = por %p1062_p13, %p1061_p12 }
  0x20   :  { %p1064_p1 = pnand %p1063_p0, %p1057_p11 }
  0x22   :  { %1067 = shalt.err (!%p1064_p1)
}
  0x23   :  { %22 = dma.hbm_to_vmem [thread:$0]  %s1218_s0, 448, %s20_s8, [#allocation3]  }
  0x24   :  { %s1068_s22 = scalar_lea.hbm %s1221_s3, 1024 }
  0x25   :  { %p1069_p2 = scmp.ne.s32.totalorder %s1221_s3, %s1068_s22  ;;  %p1072_p3 = scmp.lt.u32.totalorder %s1068_s22, %s1221_s3 }
  0x27   :  { %p1074_p4 = pnand %p1072_p3, %p1069_p2 }
  0x29   :  { %1077 = shalt.err (!%p1074_p4)
}
  0x2a   :  { %s1078_s27 = scalar_lea.vmem %s43_s10, 1024  ;;  %p1083_p6 = scmp.lt.s32.totalorder %s43_s10, %s43_s10 }
  0x2b   :  { %p1079_p5 = scmp.ne.s32.totalorder %s43_s10, %s1078_s27  ;;  %p1084_p7 = scmp.lt.s32.totalorder %s1078_s27, %s1078_s27 }
  0x2d   :  { %p1085_p8 = por %p1084_p7, %p1083_p6 }
  0x2f   :  { %p1086_p9 = pnand %p1085_p8, %p1079_p5 }
  0x31   :  { %1089 = shalt.err (!%p1086_p9)
}
  0x32   :  { %48 = dma.hbm_to_vmem [thread:$0]  %s1221_s3, 1024, %s43_s10, [#allocation6], %s1119_s28, %s1119_s28, %s1120_s29  }
  0x33   :  { %1112 = dma.done.wait [#allocation3], 448  }
  0x34   :  { %1113 = vsyncadd [#allocation3], 4294966848 }
  0x35   :  { %1114 = dma.done.wait [#allocation6], 7296  }
  0x36   :  { %1115 = vsyncadd [#allocation6], 4294960000  ;;  %v960_v0 = vld [vmem:[#allocation5 + $0x40] sm:$0xff]   ;;  %v964_v4 = vld [vmem:[#allocation5 + $0x48] sm:$0xff]   ;;  %v1123_v43 = vmov 0.0   ;;  %vm1124_vm0 = vmmov 0  }
  0x37   :  { %v961_v1 = vld [vmem:[#allocation5] sm:$0xff]   ;;  %849 = vmatprep.subr.bf16.mxu0 %v960_v0  ;;  %v965_v5 = vld [vmem:[#allocation5 + $0x8] sm:$0xff]   ;;  %v968_v8 = vld [vmem:[#allocation5 + $0x50] sm:$0xff]   ;;  %vm488_vm1 = vcmask 130048   ;;  %s1125_s6 = smov [#allocation8]  }
  0x38   :  { %v962_v2 = vld [vmem:[#allocation5 + $0xc0] sm:$0xff]   ;;  %850 = vmatpush3.bf16.msra.mxu0 %v961_v1  ;;  %v966_v6 = vld [vmem:[#allocation5 + $0xc8] sm:$0xff]   ;;  %v969_v9 = vld [vmem:[#allocation5 + $0x10] sm:$0xff]   ;;  %s772_s7 = sshll.u32 %s1125_s6, 4  ;;  %s773_s7 = int_to_ptr.vmem [resolvable:$true] %s772_s7 }
  0x39   :  { %v963_v3 = vld [vmem:[#allocation5 + $0x80] sm:$0xff]   ;;  %871 = vmatprep.subr.bf16.mxu1 %v962_v2  ;;  %851 = vmatprep.subr.bf16.mxu0 %v964_v4  ;;  %v967_v7 = vld [vmem:[#allocation5 + $0x88] sm:$0xff]   ;;  %v970_v10 = vld [vmem:[#allocation5 + $0xd0] sm:$0xff]   ;;  %s1090_s8 = scalar_lea.vmem %s773_s7, 128  ;;  %p1095_p11 = scmp.lt.s32.totalorder %s773_s7, %s773_s7 }
  0x3a   :  { %872 = vmatpush3.bf16.msra.mxu1 %v963_v3  ;;  %v971_v11 = vld [vmem:[#allocation5 + $0x90] sm:$0xff]   ;;  %v972_v12 = vld [vmem:[#allocation5 + $0x58] sm:$0xff]   ;;  %v976_v16 = vld [vmem:[#allocation5 + $0x60] sm:$0xff]   ;;  %p1091_p10 = scmp.ne.s32.totalorder %s773_s7, %s1090_s8  ;;  %p1096_p12 = scmp.lt.s32.totalorder %s1090_s8, %s1090_s8 }
  0x3b   :  { %873 = vmatprep.subr.bf16.mxu1 %v966_v6  ;;  %v973_v13 = vld [vmem:[#allocation5 + $0x18] sm:$0xff]   ;;  %v977_v17 = vld [vmem:[#allocation5 + $0x20] sm:$0xff]   ;;  %v980_v20 = vld [vmem:[#allocation5 + $0x68] sm:$0xff]  }
  0x3c   :  { %852 = vmatpush3.bf16.msra.mxu0 %v965_v5  ;;  %v974_v14 = vld [vmem:[#allocation5 + $0xd8] sm:$0xff]   ;;  %v978_v18 = vld [vmem:[#allocation5 + $0xe0] sm:$0xff]   ;;  %v981_v21 = vld [vmem:[#allocation5 + $0x28] sm:$0xff]   ;;  %p1097_p13 = por %p1096_p12, %p1095_p11 }
  0x3d   :  { %853 = vmatprep.subr.bf16.mxu0 %v968_v8  ;;  %v975_v15 = vld [vmem:[#allocation5 + $0x98] sm:$0xff]   ;;  %v979_v19 = vld [vmem:[#allocation5 + $0xa0] sm:$0xff]   ;;  %v982_v22 = vld [vmem:[#allocation5 + $0xe8] sm:$0xff]  }
  0x3e   :  { %874 = vmatpush3.bf16.msra.mxu1 %v967_v7  ;;  %v983_v23 = vld [vmem:[#allocation5 + $0xa8] sm:$0xff]   ;;  %v984_v24 = vld [vmem:[#allocation5 + $0x70] sm:$0xff]   ;;  %v988_v28 = vld [vmem:[#allocation5 + $0x78] sm:$0xff]   ;;  %p1098_p0 = pnand %p1097_p13, %p1091_p10 }
  0x3f   :  { %875 = vmatprep.subr.bf16.mxu1 %v970_v10  ;;  %v985_v25 = vld [vmem:[#allocation5 + $0x30] sm:$0xff]   ;;  %v989_v29 = vld [vmem:[#allocation5 + $0x38] sm:$0xff]   ;;  %v61_v31 = vld [vmem:[#allocation2] sm:$0xff] }
  0x40   :  { %854 = vmatpush3.bf16.msra.mxu0 %v969_v9  ;;  %v986_v26 = vld [vmem:[#allocation5 + $0xf0] sm:$0xff]   ;;  %v990_v30 = vld [vmem:[#allocation5 + $0xf8] sm:$0xff]   ;;  %v783_v32 = vcombine.low %v61_v31, %v61_v31  ;;  %v784_v33 = vcombine.high %v61_v31, %v61_v31  ;;  %v994_v35 = vld [vmem:[#allocation5 + $0x140] sm:$0xff]  }
  0x41   :  { %855 = vmatprep.subr.bf16.mxu0 %v972_v12  ;;  %v987_v27 = vld [vmem:[#allocation5 + $0xb0] sm:$0xff]   ;;  %v993_v34 = vld [vmem:[#allocation5 + $0xb8] sm:$0xff]   ;;  %v997_v39 = vld [vmem:[#allocation5 + $0x100] sm:$0xff]  }
  0x42   :  { %876 = vmatpush3.bf16.msra.mxu1 %v971_v11  ;;  %v62_v36 = vld [vmem:[#allocation2 + $0x8] sm:$0xff]  ;;  %524 = vmatprep.mubr.bf16.mxu0 %v784_v33  ;;  %v1002_v45 = vld [vmem:[#allocation5 + $0x158] sm:$0xff]   ;;  %v1004_v47 = vld [vmem:[#allocation5 + $0x160] sm:$0xff]  }
  0x43   :  { %877 = vmatprep.subr.bf16.mxu1 %v974_v14  ;;  %v785_v37 = vcombine.low %v62_v36, %v62_v36  ;;  %v786_v38 = vcombine.high %v62_v36, %v62_v36  ;;  %v998_v40 = vld [vmem:[#allocation5 + $0x148] sm:$0xff]   ;;  %v1000_v42 = vld [vmem:[#allocation5 + $0x150] sm:$0xff]   ;;  %v1003_v46 = vld [vmem:[#allocation5 + $0x118] sm:$0xff]  }
  0x44   :  { %856 = vmatpush3.bf16.msra.mxu0 %v973_v13  ;;  %v999_v41 = vld [vmem:[#allocation5 + $0x108] sm:$0xff]   ;;  %v1001_v44 = vld [vmem:[#allocation5 + $0x110] sm:$0xff]   ;;  %v1005_v48 = vld [vmem:[#allocation5 + $0x120] sm:$0xff]  }
  0x45   :  { %857 = vmatprep.subr.bf16.mxu0 %v976_v16  ;;  %564 = vmatprep.mubr.bf16.mxu1 %v786_v38  ;;  %v1006_v49 = vld [vmem:[#allocation5 + $0x168] sm:$0xff]   ;;  %v1012_v50 = vld [vmem:[#allocation5 + $0x180] sm:$0xff]   ;;  %v63_v51 = vld [vmem:[#allocation2 + $0x10] sm:$0xff] }
  0x46   :  { %878 = vmatpush3.bf16.msra.mxu1 %v975_v15  ;;  %v1007_v52 = vld [vmem:[#allocation5 + $0x128] sm:$0xff]   ;;  %v788_v53 = vcombine.high %v63_v51, %v63_v51  ;;  %v1015_v54 = vld [vmem:[#allocation2 + $0x18] ss:$0 sps:$4 sm:$0xff]   ;;  %v1008_v55 = vld [vmem:[#allocation5 + $0x170] sm:$0xff]   ;;  %v787_v59 = vcombine.low %v63_v51, %v63_v51 }
  0x47   :  { %879 = vmatprep.subr.bf16.mxu1 %v978_v18  ;;  %v1009_v56 = vld [vmem:[#allocation5 + $0x130] sm:$0xff]   ;;  %v1010_v57 = vld [vmem:[#allocation5 + $0x178] sm:$0xff]   ;;  %v1016_v60 = vld [vmem:[#allocation7] sm:$0xff]  }
  0x48   :  { %858 = vmatpush3.bf16.msra.mxu0 %v977_v17  ;;  %v1011_v58 = vld [vmem:[#allocation5 + $0x138] sm:$0xff]   ;;  %v1017_v61 = vld [vmem:[#allocation7 + $0x8] sm:$0xff]   ;;  %v1019_v63 = vld [vmem:[#allocation7 + $0x18] sm:$0xff]  }
  0x49   :  { %859 = vmatprep.subr.bf16.mxu0 %v980_v20  ;;  %v1018_v62 = vld [vmem:[#allocation7 + $0x10] sm:$0xff]   ;;  %v1020_v0 = vld [vmem:[#allocation7 + $0x20] sm:$0xff]   ;;  %v1021_v1 = vld [vmem:[#allocation7 + $0x28] sm:$0xff]  }
  0x4a   :  { %880 = vmatpush3.bf16.msra.mxu1 %v979_v19  ;;  %v1022_v2 = vld [vmem:[#allocation7 + $0x30] sm:$0xff]   ;;  %v1023_v3 = vld [vmem:[#allocation7 + $0x38] sm:$0xff]  }
  0x4b   :  { %881 = vmatprep.subr.bf16.mxu1 %v982_v22  ;;  %v782_v5 = vld [vmem:[%s1220_s2] ss:$0 sm:$0xff] }
  0x4c   :  { %860 = vmatpush3.bf16.msra.mxu0 %v981_v21 }
  0x4d   :  { %861 = vmatprep.subr.bf16.mxu0 %v984_v24 }
  0x4e   :  { %882 = vmatpush3.bf16.msra.mxu1 %v983_v23 }
  0x4f   :  { %883 = vmatprep.subr.bf16.mxu1 %v986_v26 }
  0x50   :  { %862 = vmatpush3.bf16.msra.mxu0 %v985_v25 }
  0x51   :  { %863 = vmatprep.subr.bf16.mxu0 %v988_v28 }
  0x52   :  { %884 = vmatpush3.bf16.msra.mxu1 %v987_v27 }
  0x53   :  { %885 = vmatprep.subr.bf16.mxu1 %v990_v30  ;;  %v840_v30 = vld [vmem:[%s1222_s4] ss:$0 sm:$0xff] }
  0x54   :  { %864 = vmatpush3.bf16.msra.mxu0 %v989_v29 }
  0x55   :  { %893 = vmatprep.subr.bf16.mxu0 %v994_v35 }
  0x56   :  { %886 = vmatpush3.bf16.msra.mxu1 %v993_v34 }
  0x57   :  { %525 = vmatmul.mubr.bf16.vlgmr.msra.gmra.mrb[0].mxu0 %v783_v32  ;;  %926 = vmatprep.subr.bf16.mxu1 %v1123_v43 }
  0x58   :  { %894 = vmatpush3.bf16.msra.mxu0 %v997_v39  ;;  %604 = vmatprep.mubr.bf16.mxu0 %v788_v53 }
  0x59   :  { %565 = vmatmul.mubr.bf16.vlgmr.msra.gmra.mrb[0].mxu1 %v785_v37  ;;  %895 = vmatprep.subr.bf16.mxu0 %v998_v40 }
  0x5a   :  { %928 = vmatprep.mubr.msk.bf16.mxu1 %vm1124_vm0, %v1123_v43  ;;  %927 = vmatpush3.bf16.msra.mxu1 %v1012_v50 }
  0x5b   :  { %932 = vmatprep.subr.bf16.mxu1 %v1123_v43 }
  0x5c   :  { %896 = vmatpush3.bf16.msra.mxu0 %v999_v41 }
  0x5d   :  { %897 = vmatprep.subr.bf16.mxu0 %v1000_v42 }
  0x60   :  { %898 = vmatpush3.bf16.msra.mxu0 %v1001_v44 }
  0x61   :  { %899 = vmatprep.subr.bf16.mxu0 %v1002_v45  ;;  %929 = vmatmul.mubr.msk.bf16.vlgmr.msra.gmra.mrb[4].mxu1 %vm488_vm1, %v1015_v54 }
  0x62   :  { %948 = vmatprep.mubr.msk.bf16.mxu1 %vm1124_vm0, %v1123_v43  ;;  %933 = vmatpush3.bf16.msra.mxu1 %v1016_v60 }
  0x63   :  { %934 = vmatprep.subr.bf16.mxu1 %v1123_v43 }
  0x64   :  { %900 = vmatpush3.bf16.msra.mxu0 %v1003_v46 }
  0x65   :  { %901 = vmatprep.subr.bf16.mxu0 %v1004_v47 }
  0x66   :  { %935 = vmatpush3.bf16.msra.mxu1 %v1017_v61 }
  0x67   :  { %936 = vmatprep.subr.bf16.mxu1 %v1123_v43 }
  0x68   :  { %902 = vmatpush3.bf16.msra.mxu0 %v1005_v48 }
  0x69   :  { %903 = vmatprep.subr.bf16.mxu0 %v1006_v49 }
  0x6a   :  { %937 = vmatpush3.bf16.msra.mxu1 %v1018_v62 }
  0x6b   :  { %938 = vmatprep.subr.bf16.mxu1 %v1123_v43 }
  0x6c   :  { %904 = vmatpush3.bf16.msra.mxu0 %v1007_v52 }
  0x6d   :  { %905 = vmatprep.subr.bf16.mxu0 %v1008_v55 }
  0x6e   :  { %939 = vmatpush3.bf16.msra.mxu1 %v1019_v63 }
  0x6f   :  { %940 = vmatprep.subr.bf16.mxu1 %v1123_v43 }
  0x70   :  { %906 = vmatpush3.bf16.msra.mxu0 %v1009_v56 }
  0x71   :  { %907 = vmatprep.subr.bf16.mxu0 %v1010_v57 }
  0x72   :  { %941 = vmatpush3.bf16.msra.mxu1 %v1020_v0 }
  0x73   :  { %942 = vmatprep.subr.bf16.mxu1 %v1123_v43 }
  0x74   :  { %908 = vmatpush3.bf16.msra.mxu0 %v1011_v58 }
  0x76   :  { %943 = vmatpush3.bf16.msra.mxu1 %v1021_v1 }
  0x77   :  { %605 = vmatmul.mubr.bf16.vlgmr.msra.gmra.mrb[4].mxu0 %v787_v59  ;;  %944 = vmatprep.subr.bf16.mxu1 %v1123_v43 }
  0x7a   :  { %945 = vmatpush3.bf16.msra.mxu1 %v1022_v2 }
  0x7b   :  { %946 = vmatprep.subr.bf16.mxu1 %v1123_v43 }
  0x7e   :  { %947 = vmatpush3.bf16.msra.mxu1 %v1023_v3 }
 0x12a   :  { %v865_v4 = vpop.f32.mrb[0].mxu0 }
 0x12b   :  { %v866_v6 = vpop.f32.mrb[1].mxu0 }
 0x12c   :  { %v867_v7 = vadd.f32 %v866_v6, %v865_v4  ;;  %v868_v8 = vpop.f32.mrb[2].mxu0  ;;  %v887_v9 = vpop.f32.mrb[0].mxu1 }
 0x12d   :  { %v869_v10 = vpop.f32.mrb[3].mxu0  ;;  %v888_v11 = vpop.f32.mrb[1].mxu1 }
 0x12e   :  { %v527_v12 = vadd.f32 %v867_v7, %v782_v5  ;;  %v889_v13 = vadd.f32 %v888_v11, %v887_v9  ;;  %v890_v14 = vpop.f32.mrb[2].mxu1 }
 0x12f   :  { %v891_v15 = vpop.f32.mrb[3].mxu1 }
 0x130   :  { %v567_v16 = vadd.f32 %v889_v13, %v527_v12 }
 0x134   :  { %v646_v17 = vpop.f32.mrb[4].mxu1 }
 0x135   :  { %v930_v18 = vpop.f32.mrb[5].mxu1 }
 0x136   :  { %v649_v19 = vpop.f32.mrb[6].mxu1 }
 0x137   :  { %v931_v20 = vpop.f32.mrb[7].mxu1 }
 0x14a   :  { %v909_v21 = vpop.f32.mrb[4].mxu0 }
 0x14b   :  { %v910_v22 = vpop.f32.mrb[5].mxu0 }
 0x14c   :  { %v911_v23 = vadd.f32 %v910_v22, %v909_v21  ;;  %v912_v24 = vpop.f32.mrb[6].mxu0 }
 0x14d   :  { %v913_v25 = vpop.f32.mrb[7].mxu0 }
 0x14e   :  { %v607_v26 = vadd.f32 %v911_v23, %v567_v16 }
 0x150   :  { %v647_v27 = vadd.f32 %v646_v17, %v607_v26 }
 0x152   :  { %v652_v28 = vmax.f32 %v647_v27, 0.0 }
 0x154   :  { %v653_v29 = vpack.c.bf16 %v652_v28, %v652_v28 }
 0x156   :  { %949 = vmatmul.mubr.bf16.vlgmr.msra.gmra.mrb[8].mxu1 %v653_v29 }
 0x229   :  { %v759_v31 = vpop.f32.mrb[8].mxu1 }
 0x22a   :  { %v760_v32 = vadd.f32 %v840_v30, %v759_v31  ;;  %v950_v33 = vpop.f32.mrb[9].mxu1 }
 0x22b   :  { %v762_v34 = vpop.f32.mrb[10].mxu1 }
 0x22c   :  { %765 = vst [vmem:[#allocation8] sm:$0xff] %v760_v32  ;;  %v951_v35 = vpop.f32.mrb[11].mxu1 }
 0x22d   :  { %1101 = shalt.err (!%p1098_p0)
}
 0x22e   :  { %s1102_s4 = scalar_lea.hbm %s1223_s5, 128 }
 0x22f   :  { %p1103_p1 = scmp.ne.s32.totalorder %s1223_s5, %s1102_s4  ;;  %p1106_p2 = scmp.lt.u32.totalorder %s1102_s4, %s1223_s5 }
 0x231   :  { %p1108_p3 = pnand %p1106_p2, %p1103_p1 }
 0x233   :  { %1111 = shalt.err (!%p1108_p3)
}
 0x234   :  { %775 = dma.vmem_to_hbm [thread:$0]  %s773_s7, 128, %s1223_s5, [#allocation4]  }
 0x235   :  { %1116 = dma.done.wait [#allocation4], 128  }
 0x236   :  { %1117 = vsyncadd [#allocation4], 4294967168 }
 0x237   :  { %779 = vsyncpa [#allocation3], 1 }
 0x238   :  { %780 = vsyncpa [#allocation6], 1 }
 0x239   :  { %781 = vsyncpa [#allocation4], 1 }

</bundles_post_ra>
